<compile_context>
chip_gen: v7x
topology: tpu7x:2x2x1
jax: 0.10.0
libtpu: 0.0.40
codegen_flags: <defaults>
</compile_context>

<pallas_src>
import functools

import jax
import jax.numpy as jnp
import numpy as np
from jax import lax
from jax.experimental import pallas as pl
from jax.experimental.pallas import tpu as pltpu

D_IN, D_H1, D_H2, D_OUT = 16, 32, 16, 4


def _round_up(n: int, m: int) -> int:
    return ((n + m - 1) // m) * m


def _cdiv(a: int, b: int) -> int:
    return (a + b - 1) // b


def _device_kind() -> str:
    try:
        return jax.devices()[0].device_kind.lower()
    except Exception:  # pragma: no cover - defensive
        return ""


def _default_use_bf16() -> bool:
    # bf16 MXU inputs pay off on v6e/v7x (f32 lowers to a ~3x multi-pass bf16
    # decomposition and the MXU-push slot binds first); v5e is HBM-bound so
    # keep the exact f32 path there.
    kind = _device_kind()
    return ("v6" in kind) or ("v7" in kind)


def _default_block_b() -> int:
    # v7x (3.2 TB/s HBM) amortizes the ~0.35us per-step overhead best with
    # ~64K tiles; 32K is plenty on v5e/v6e and fits default scoped VMEM budgets.
    return 65536 if "v7" in _device_kind() else 32768


def _make_kernel(mxu_dtype):
    def mlp_kernel(x_ref, w1_ref, b1_ref, w2_ref, b2_ref, w3_ref, b3_ref, o_ref):
        # x_ref: (TB, 16) in natural layout.  Compute feature-major:
        #     out.T = W3 @ relu(W2 @ relu(W1 @ x.T + b1) + b2) + b3
        # so the batch lives on the 128-lane axis and the (4, TB) store is
        # lane-dense.  The x orientation flip is folded into the first
        # dot_general (contract both feature axes).
        xt = x_ref[...].astype(mxu_dtype)                                 # (TB, 16)
        h1 = lax.dot_general(w1_ref[...], xt,
                             dimension_numbers=(((1,), (1,)), ((), ())),
                             preferred_element_type=jnp.float32)          # (32, TB)
        h1 = jnp.maximum(h1 + b1_ref[...], 0.0)
        h2 = jnp.dot(w2_ref[...], h1.astype(mxu_dtype),
                     preferred_element_type=jnp.float32)                  # (16, TB)
        h2 = jnp.maximum(h2 + b2_ref[...], 0.0)
        out = jnp.dot(w3_ref[...], h2.astype(mxu_dtype),
                      preferred_element_type=jnp.float32)                 # (4, TB)
        o_ref[...] = (out + b3_ref[...]).astype(o_ref.dtype)

    return mlp_kernel


@functools.partial(jax.jit, static_argnames=("block_b", "use_bf16"))
def _forward(x, params, *, block_b: int, use_bf16: bool):
    (w1, b1, w2, b2, w3, b3) = params
    B = x.shape[0]
    assert x.shape[1] == D_IN, f"expected (B, {D_IN}) input, got {x.shape}"

    # ---- batch tiling ----------------------------------------------------
    # Need at least one full 128-lane block; only the tiny B<128 case is padded.
    b_eff = B
    if b_eff < 128:
        x = jnp.pad(x, ((0, 128 - b_eff), (0, 0)))
        b_eff = 128

    block_b = max(128, (int(block_b) // 128) * 128)       # force multiple of 128
    tb = min(block_b, (b_eff // 128) * 128)               # block never exceeds array
    # Keep >=2 grid steps on large batches so the "parallel" batch axis can be
    # split across v7x's two TensorCores.
    if _cdiv(b_eff, tb) == 1 and b_eff >= 2 * 16384:
        tb = _round_up(_cdiv(b_eff, 2), 128)
    num_blocks = _cdiv(b_eff, tb)

    # ---- parameter prep (tiny; VMEM-pinned in the kernel) ------------------
    mxu_dtype = jnp.bfloat16 if use_bf16 else jnp.float32
    w1c = w1.astype(mxu_dtype)
    w2c = w2.astype(mxu_dtype)
    w3c = w3.astype(mxu_dtype)
    b1c = b1.reshape(D_H1, 1).astype(jnp.float32)
    b2c = b2.reshape(D_H2, 1).astype(jnp.float32)
    b3c = b3.reshape(D_OUT, 1).astype(jnp.float32)

    const = lambda a: pl.BlockSpec(a.shape, lambda i: (0, 0))

    flops = 2 * b_eff * (D_IN * D_H1 + D_H1 * D_H2 + D_H2 * D_OUT)
    bytes_accessed = 4 * b_eff * (D_IN + D_OUT) + 4 * (
        D_IN * D_H1 + D_H1 + D_H1 * D_H2 + D_H2 + D_H2 * D_OUT + D_OUT)

    out_t = pl.pallas_call(
        _make_kernel(mxu_dtype),
        out_shape=jax.ShapeDtypeStruct((D_OUT, b_eff), jnp.float32),
        grid=(num_blocks,),
        in_specs=[
            # Streamed x tiles: natural layout, contiguous HBM reads,
            # double-buffered by the BlockSpec pipeline.
            pl.BlockSpec((tb, D_IN), lambda i: (i, 0)),
            const(w1c), const(b1c),
            const(w2c), const(b2c),
            const(w3c), const(b3c),
        ],
        # Lane-dense feature-major output tile (4, TB): unmasked stores.
        out_specs=pl.BlockSpec((D_OUT, tb), lambda i: (0, i)),
        compiler_params=pltpu.CompilerParams(
            dimension_semantics=("parallel",),      # shard batch across v7x's 2 TCs
            vmem_limit_bytes=48 * 1024 * 1024,      # big tiles; under v7x's 64 MiB
        ),
        cost_estimate=pl.CostEstimate(
            flops=flops, transcendentals=0, bytes_accessed=bytes_accessed),
    )(x, w1c, b1c, w2c, b2c, w3c, b3c)

    # Undo the feature-major layout plumbing: (4, b_eff) -> (B, 4).
    return out_t[:, :B].T


def snake_simple_model(x, params, *, block_b=None, use_bf16=None):
    """Forward pass of SnakeSimpleModel.

    x: (B, 16) float32.  params: PyTorch-layout (W(out,in), b(out,)) x 3.
    block_b / use_bf16 default to generation-aware choices (bf16 MXU inputs on
    v6e/v7x, f32 elsewhere; 64K tiles on v7x, 32K elsewhere).
    """
    if block_b is None:
        block_b = _default_block_b()
    if use_bf16 is None:
        use_bf16 = _default_use_bf16()
    return _forward(x, params, block_b=int(block_b), use_bf16=bool(use_bf16))


def init_params(key):
    """Deterministic init mirroring the PyTorch module.

    fc1: Linear(16, 32), fc2: Linear(32, 16), fc3: Linear(16, 4); weights in
    PyTorch (out_features, in_features) layout with kaiming_uniform-style
    bounds, biases with Linear's default uniform init.
    """
    dims = [(D_IN, D_H1), (D_H1, D_H2), (D_H2, D_OUT)]
    params = []
    keys = jax.random.split(key, 2 * len(dims))
    for i, (fan_in, fan_out) in enumerate(dims):
        w_bound = np.sqrt(2.0) * np.sqrt(3.0 / fan_in)   # kaiming_uniform_ (a=0)
        b_bound = 1.0 / np.sqrt(fan_in)
        w = jax.random.uniform(keys[2 * i], (fan_out, fan_in),
                               minval=-w_bound, maxval=w_bound, dtype=jnp.float32)
        b = jax.random.uniform(keys[2 * i + 1], (fan_out,),
                               minval=-b_bound, maxval=b_bound, dtype=jnp.float32)
        params.extend([w, b])
    return tuple(params)


def reference(x, params):
    (w1, b1, w2, b2, w3, b3) = params
    h = jnp.maximum(x @ w1.T + b1, 0.0)
    h = jnp.maximum(h @ w2.T + b2, 0.0)
    return h @ w3.T + b3


if __name__ == "__main__":
    key = jax.random.PRNGKey(0)
    k_x, k_x2, k_p = jax.random.split(key, 3)
    params = init_params(k_p)

    # Small batch at the module's native shapes.
    x_small = jax.random.normal(k_x, (8, D_IN), dtype=jnp.float32)
    ref_small = reference(x_small, params)

    # Exact f32 path: matches the f32 reference tightly.
    out_f32 = jax.block_until_ready(
        snake_simple_model(x_small, params, use_bf16=False))
    np.testing.assert_allclose(np.asarray(out_f32), np.asarray(ref_small),
                               rtol=1e-5, atol=1e-5)

    # bf16-MXU fast path (v6e/v7x recommendation): looser tolerance.
    out_bf16 = jax.block_until_ready(
        snake_simple_model(x_small, params, use_bf16=True))
    np.testing.assert_allclose(np.asarray(out_bf16), np.asarray(ref_small),
                               rtol=5e-2, atol=5e-2)

    # Non-multiple-of-128 batch exercises the ragged trailing block + multi-step
    # grid, using the generation-aware defaults.
    x_big = jax.random.normal(k_x2, (300, D_IN), dtype=jnp.float32)
    out_big = jax.block_until_ready(snake_simple_model(x_big, params))
    np.testing.assert_allclose(np.asarray(out_big),
                               np.asarray(reference(x_big, params)),
                               rtol=5e-2, atol=5e-2)

    print("KERNEL_OK")
</pallas_src>

<mosaic_0001>
module attributes {stable_mosaic.version = 11 : i64} {
  func.func @mlp_kernel(%arg0: i32, %arg1: memref<128x16xf32, #tpu.memory_space<vmem>>, %arg2: memref<32x16xf32, #tpu.memory_space<vmem>>, %arg3: memref<32x1xf32, #tpu.memory_space<vmem>>, %arg4: memref<16x32xf32, #tpu.memory_space<vmem>>, %arg5: memref<16x1xf32, #tpu.memory_space<vmem>>, %arg6: memref<4x16xf32, #tpu.memory_space<vmem>>, %arg7: memref<4x1xf32, #tpu.memory_space<vmem>>, %arg8: memref<4x128xf32, #tpu.memory_space<vmem>>) attributes {dimension_semantics = [#tpu.dimension_semantics<parallel>], iteration_bounds = array<i64: 1>, scalar_prefetch = 0 : i64, scratch_operands = 0 : i64, tpu.core_type = #tpu.core_type<tc>, window_params = [{transform_indices = @transform_0, window_bounds = array<i64: 128, 16>}, {pipeline_mode = #tpu.pipeline_mode<synchronous>, transform_indices = @transform_1, window_bounds = array<i64: 32, 16>}, {pipeline_mode = #tpu.pipeline_mode<synchronous>, transform_indices = @transform_2, window_bounds = array<i64: 32, 1>}, {pipeline_mode = #tpu.pipeline_mode<synchronous>, transform_indices = @transform_3, window_bounds = array<i64: 16, 32>}, {pipeline_mode = #tpu.pipeline_mode<synchronous>, transform_indices = @transform_4, window_bounds = array<i64: 16, 1>}, {pipeline_mode = #tpu.pipeline_mode<synchronous>, transform_indices = @transform_5, window_bounds = array<i64: 4, 16>}, {pipeline_mode = #tpu.pipeline_mode<synchronous>, transform_indices = @transform_6, window_bounds = array<i64: 4, 1>}, {transform_indices = @transform_7, window_bounds = array<i64: 4, 128>}]} {
    %c0 = arith.constant 0 : index
    %c0_0 = arith.constant 0 : index
    %0 = vector.load %arg1[%c0, %c0_0] : memref<128x16xf32, #tpu.memory_space<vmem>>, vector<128x16xf32>
    %c0_1 = arith.constant 0 : index
    %c0_2 = arith.constant 0 : index
    %1 = vector.load %arg2[%c0_1, %c0_2] : memref<32x16xf32, #tpu.memory_space<vmem>>, vector<32x16xf32>
    %cst = arith.constant dense<0.000000e+00> : vector<32x128xf32>
    %2 = tpu.matmul %1, %0, %cst {dimension_numbers = #tpu.dot_dimension_numbers<[1], [1], [0], [0], [0, 0, 1, 0], [], []>} : vector<32x16xf32>, vector<128x16xf32>, vector<32x128xf32> -> vector<32x128xf32>
    %c0_3 = arith.constant 0 : index
    %c0_4 = arith.constant 0 : index
    %3 = vector.load %arg3[%c0_3, %c0_4] : memref<32x1xf32, #tpu.memory_space<vmem>>, vector<32x1xf32>
    %4 = vector.broadcast %3 : vector<32x1xf32> to vector<32x128xf32>
    %5 = arith.addf %2, %4 : vector<32x128xf32>
    %cst_5 = arith.constant 0.000000e+00 : f32
    %6 = vector.broadcast %cst_5 : f32 to vector<32x128xf32>
    %7 = arith.maximumf %5, %6 : vector<32x128xf32>
    %c0_6 = arith.constant 0 : index
    %c0_7 = arith.constant 0 : index
    %8 = vector.load %arg4[%c0_6, %c0_7] : memref<16x32xf32, #tpu.memory_space<vmem>>, vector<16x32xf32>
    %cst_8 = arith.constant dense<0.000000e+00> : vector<16x128xf32>
    %9 = tpu.matmul %8, %7, %cst_8 {dimension_numbers = #tpu.dot_dimension_numbers<[1], [0], [0], [1], [0, 0, 1, 1], [], []>} : vector<16x32xf32>, vector<32x128xf32>, vector<16x128xf32> -> vector<16x128xf32>
    %c0_9 = arith.constant 0 : index
    %c0_10 = arith.constant 0 : index
    %10 = vector.load %arg5[%c0_9, %c0_10] : memref<16x1xf32, #tpu.memory_space<vmem>>, vector<16x1xf32>
    %11 = vector.broadcast %10 : vector<16x1xf32> to vector<16x128xf32>
    %12 = arith.addf %9, %11 : vector<16x128xf32>
    %cst_11 = arith.constant 0.000000e+00 : f32
    %13 = vector.broadcast %cst_11 : f32 to vector<16x128xf32>
    %14 = arith.maximumf %12, %13 : vector<16x128xf32>
    %c0_12 = arith.constant 0 : index
    %c0_13 = arith.constant 0 : index
    %15 = vector.load %arg6[%c0_12, %c0_13] : memref<4x16xf32, #tpu.memory_space<vmem>>, vector<4x16xf32>
    %cst_14 = arith.constant dense<0.000000e+00> : vector<4x128xf32>
    %16 = tpu.matmul %15, %14, %cst_14 {dimension_numbers = #tpu.dot_dimension_numbers<[1], [0], [0], [1], [0, 0, 1, 1], [], []>} : vector<4x16xf32>, vector<16x128xf32>, vector<4x128xf32> -> vector<4x128xf32>
    %c0_15 = arith.constant 0 : index
    %c0_16 = arith.constant 0 : index
    %17 = vector.load %arg7[%c0_15, %c0_16] : memref<4x1xf32, #tpu.memory_space<vmem>>, vector<4x1xf32>
    %18 = vector.broadcast %17 : vector<4x1xf32> to vector<4x128xf32>
    %19 = arith.addf %16, %18 : vector<4x128xf32>
    %c0_17 = arith.constant 0 : index
    %c0_18 = arith.constant 0 : index
    %20 = vector.load %arg8[%c0_17, %c0_18] : memref<4x128xf32, #tpu.memory_space<vmem>>, vector<4x128xf32>
    tpu.vector_store %arg8[%c0_17, %c0_18], %19 {strides = array<i32>} : memref<4x128xf32, #tpu.memory_space<vmem>>, vector<4x128xf32>,
    return
  }
  func.func @transform_0(%arg0: i32) -> (i32, i32) {
    %c0_i32 = arith.constant 0 : i32
    %c0_i32_0 = arith.constant 0 : i32
    return %arg0, %c0_i32 : i32, i32
  }
  func.func @transform_1(%arg0: i32) -> (i32, i32) {
    %c0_i32 = arith.constant 0 : i32
    %c0_i32_0 = arith.constant 0 : i32
    %c0_i32_1 = arith.constant 0 : i32
    return %c0_i32, %c0_i32_0 : i32, i32
  }
  func.func @transform_2(%arg0: i32) -> (i32, i32) {
    %c0_i32 = arith.constant 0 : i32
    %c0_i32_0 = arith.constant 0 : i32
    %c0_i32_1 = arith.constant 0 : i32
    return %c0_i32, %c0_i32_0 : i32, i32
  }
  func.func @transform_3(%arg0: i32) -> (i32, i32) {
    %c0_i32 = arith.constant 0 : i32
    %c0_i32_0 = arith.constant 0 : i32
    %c0_i32_1 = arith.constant 0 : i32
    return %c0_i32, %c0_i32_0 : i32, i32
  }
  func.func @transform_4(%arg0: i32) -> (i32, i32) {
    %c0_i32 = arith.constant 0 : i32
    %c0_i32_0 = arith.constant 0 : i32
    %c0_i32_1 = arith.constant 0 : i32
    return %c0_i32, %c0_i32_0 : i32, i32
  }
  func.func @transform_5(%arg0: i32) -> (i32, i32) {
    %c0_i32 = arith.constant 0 : i32
    %c0_i32_0 = arith.constant 0 : i32
    %c0_i32_1 = arith.constant 0 : i32
    return %c0_i32, %c0_i32_0 : i32, i32
  }
  func.func @transform_6(%arg0: i32) -> (i32, i32) {
    %c0_i32 = arith.constant 0 : i32
    %c0_i32_0 = arith.constant 0 : i32
    %c0_i32_1 = arith.constant 0 : i32
    return %c0_i32, %c0_i32_0 : i32, i32
  }
  func.func @transform_7(%arg0: i32) -> (i32, i32) {
    %c0_i32 = arith.constant 0 : i32
    %c0_i32_0 = arith.constant 0 : i32
    return %c0_i32, %arg0 : i32, i32
  }
}

</mosaic_0001>

<bundles_post_ra>
// kernel: _forward.1
= control target key start
LH: loop header
LB: loop body
LE: loop exit
PB: predicated region body
PF: predicated region fallthrough
CT: control target
= control target key end

     0   :  { %vm70_vm0 = vcmask 130048   ;;  %v576_v3 = vmov 0   ;;  %vm234_vm2 = vcmask 261120   ;;  %v577_v57 = vmov 0.0|0.0   ;;  %s758_s0 = inlined_call_operand.vmem [shape: f32[128,16], index: 0, kind: input, shape index: {}]   ;;  %s759_s1 = inlined_call_operand.vmem [shape: f32[32,16], index: 1, kind: input, shape index: {}]   ;;  %s760_s2 = inlined_call_operand.vmem [shape: f32[32,1], index: 2, kind: input, shape index: {}]   ;;  %s761_s4 = inlined_call_operand.vmem [shape: f32[16,1], index: 4, kind: input, shape index: {}]   ;;  %s762_s6 = inlined_call_operand.vmem [shape: f32[4,1], index: 6, kind: input, shape index: {}]   ;;  %s763_s3 = inlined_call_operand.vmem [shape: f32[16,32], index: 3, kind: input, shape index: {}]   ;;  %s764_s5 = inlined_call_operand.vmem [shape: f32[4,16], index: 5, kind: input, shape index: {}]   ;;  %s765_s7 = inlined_call_operand.vmem [shape: f32[4,128], index: 7, kind: output, shape index: {}]  }
   0x1   :  { %v26_v0 = vld [vmem:[%s758_s0] sm:$0xff]  ;;  %v27_v1 = vld [vmem:[%s758_s0 + $0x8] sm:$0xff]  ;;  %vm628_vm1 = vmpackc.low %vm70_vm0, %vm70_vm0  ;;  %574 = vset.pattern.permute.xlu0 %v576_v3  ;;  %575 = vset.pattern.permute.xlu1 %v576_v3  ;;  %vm578_vm3 = vmmov 0   ;;  %v579_v58 = vmov 0.0  }
   0x2   :  { %v511_v4 = vpack.c.bf16 %v27_v1, %v26_v0  ;;  %v28_v5 = vld [vmem:[%s758_s0 + $0x10] sm:$0xff]  ;;  %v29_v6 = vld [vmem:[%s758_s0 + $0x18] sm:$0xff]  ;;  %v42_v8 = vld [vmem:[%s759_s1] sm:$0xff] }
   0x3   :  { %v517_v7 = vpack.c.bf16 %v29_v6, %v28_v5  ;;  %v30_v9 = vld [vmem:[%s758_s0 + $0x20] sm:$0xff]  ;;  %v31_v10 = vld [vmem:[%s758_s0 + $0x28] sm:$0xff]  ;;  %487 = vmatprep.mubr.msk.f32.mxu0 %vm70_vm0, %v42_v8  ;;  %v48_v12 = vld [vmem:[%s760_s2 + $0x10] sm:$0xff] }
   0x4   :  { %513 = vmatprep.subr.msk.bf16.mxu0 %vm628_vm1, %v511_v4  ;;  %v46_v11 = vld [vmem:[%s760_s2] sm:$0xff]  ;;  %62 = vperm.xlu1 %575, %v48_v12   ;;  %v523_v13 = vpack.c.bf16 %v31_v10, %v30_v9  ;;  %v47_v14 = vld [vmem:[%s760_s2 + $0x8] sm:$0xff]  ;;  %v49_v15 = vld [vmem:[%s760_s2 + $0x18] sm:$0xff] }
   0x5   :  { %516 = vmatpush3.bf16.xpose.msk.msra.mxu0 %vm628_vm1, %v511_v4  ;;  %52 = vperm.xlu0 %574, %v46_v11   ;;  %v222_v16 = vld [vmem:[%s761_s4] sm:$0xff]  ;;  %v32_v17 = vld [vmem:[%s758_s0 + $0x30] sm:$0xff]  ;;  %v33_v18 = vld [vmem:[%s758_s0 + $0x38] sm:$0xff] }
   0x6   :  { %519 = vmatprep.subr.msk.bf16.mxu0 %vm628_vm1, %v517_v7  ;;  %v223_v19 = vld [vmem:[%s761_s4 + $0x8] sm:$0xff]  ;;  %v529_v20 = vpack.c.bf16 %v33_v18, %v32_v17  ;;  %v319_v21 = vld [vmem:[%s762_s6] sm:$0xf]  ;;  %v36_v25 = vld [vmem:[%s758_s0 + $0x50] sm:$0xff] }
   0x7   :  { %v34_v22 = vld [vmem:[%s758_s0 + $0x40] sm:$0xff]  ;;  %v35_v23 = vld [vmem:[%s758_s0 + $0x48] sm:$0xff]  ;;  %v37_v26 = vld [vmem:[%s758_s0 + $0x58] sm:$0xff] }
   0x8   :  { %67 = vperm.xlu1 %575, %v49_v15   ;;  %v535_v24 = vpack.c.bf16 %v35_v23, %v34_v22  ;;  %v541_v27 = vpack.c.bf16 %v37_v26, %v36_v25  ;;  %v38_v28 = vld [vmem:[%s758_s0 + $0x60] sm:$0xff]  ;;  %v39_v29 = vld [vmem:[%s758_s0 + $0x68] sm:$0xff]  ;;  %v40_v31 = vld [vmem:[%s758_s0 + $0x70] sm:$0xff] }
   0x9   :  { %57 = vperm.xlu0 %574, %v47_v14   ;;  %v547_v30 = vpack.c.bf16 %v39_v29, %v38_v28  ;;  %v41_v32 = vld [vmem:[%s758_s0 + $0x78] sm:$0xff]  ;;  %v43_v34 = vld [vmem:[%s759_s1 + $0x8] sm:$0xff]  ;;  %v44_v35 = vld [vmem:[%s759_s1 + $0x10] sm:$0xff] }
   0xa   :  { %v553_v33 = vpack.c.bf16 %v41_v32, %v40_v31  ;;  %v45_v36 = vld [vmem:[%s759_s1 + $0x18] sm:$0xff]  ;;  %v220_v37 = vld [vmem:[%s763_s3] sm:$0xff]  ;;  %v221_v56 = vld [vmem:[%s763_s3 + $0x8] sm:$0xff] }
   0xb   :  { %501 = vmatprep.mubr.msk.f32.mxu1 %vm234_vm2, %v220_v37  ;;  %v318_v4 = vld [vmem:[%s764_s5] sm:$0xf] }
   0xc   :  { %231 = vperm.xlu1 %575, %v223_v19  }
   0xd   :  { %522 = vmatpush3.bf16.xpose.msk.msra.mxu0 %vm628_vm1, %v517_v7  ;;  %226 = vperm.xlu0 %574, %v222_v16  }
   0xe   :  { %525 = vmatprep.subr.msk.bf16.mxu0 %vm628_vm1, %v523_v13 }
  0x11   :  { %322 = vperm.xlu0 %574, %v319_v21  }
  0x15   :  { %528 = vmatpush3.bf16.xpose.msk.msra.mxu0 %vm628_vm1, %v523_v13 }
  0x16   :  { %531 = vmatprep.subr.msk.bf16.mxu0 %vm628_vm1, %v529_v20 }
  0x1d   :  { %534 = vmatpush3.bf16.xpose.msk.msra.mxu0 %vm628_vm1, %v529_v20 }
  0x1e   :  { %537 = vmatprep.subr.msk.bf16.mxu0 %vm628_vm1, %v535_v24 }
  0x25   :  { %540 = vmatpush3.bf16.xpose.msk.msra.mxu0 %vm628_vm1, %v535_v24 }
  0x26   :  { %543 = vmatprep.subr.msk.bf16.mxu0 %vm628_vm1, %v541_v27 }
  0x2d   :  { %546 = vmatpush3.bf16.xpose.msk.msra.mxu0 %vm628_vm1, %v541_v27 }
  0x2e   :  { %549 = vmatprep.subr.msk.bf16.mxu0 %vm628_vm1, %v547_v30 }
  0x35   :  { %552 = vmatpush3.bf16.xpose.msk.msra.mxu0 %vm628_vm1, %v547_v30 }
  0x36   :  { %555 = vmatprep.subr.msk.bf16.mxu0 %vm628_vm1, %v553_v33 }
  0x3d   :  { %558 = vmatpush3.bf16.xpose.msk.msra.mxu0 %vm628_vm1, %v553_v33 }
  0x44   :  { %488 = vmatmul.mubr.msk.f32.vlgmr.msra.gmra.mrb[0].mxu0 %vm70_vm0, %v43_v34 }
  0x45   :  { %490 = vmatprep.mubr.msk.f32.mxu0 %vm70_vm0, %v44_v35 }
  0x48   :  { %491 = vmatmul.mubr.msk.f32.gmra.mrb[2].mxu0 %vm70_vm0, %v45_v36 }
  0x83   :  { %v63_v39 = vpop.permute.xlu1 %62 }
  0x84   :  { %v53_v38 = vpop.permute.xlu0 %52 }
  0x87   :  { %v68_v46 = vpop.permute.xlu1 %67 }
  0x88   :  { %v58_v40 = vpop.permute.xlu0 %57 }
  0x8b   :  { %v232_v59 = vpop.permute.xlu1 %231 }
  0x8c   :  { %v227_v61 = vpop.permute.xlu0 %226 }
  0x90   :  { %v323_v5 = vpop.permute.xlu0 %322 }
 0x117   :  { %v489_v41 = vpop.f32.mrb[0].mxu0 }
 0x118   :  { %v203_v42 = vadd.f32 %v489_v41, %v58_v40  ;;  %v197_v43 = vpop.f32.mrb[1].mxu0 }
 0x119   :  { %v198_v44 = vadd.f32 %v197_v43, %v53_v38 }
 0x11a   :  { %v217_v45 = vmax.f32 %v203_v42, 0.0 }
 0x11b   :  { %v216_v47 = vmax.f32 %v198_v44, 0.0  ;;  %v492_v48 = vpop.f32.mrb[2].mxu0 }
 0x11c   :  { %v213_v49 = vadd.f32 %v492_v48, %v68_v46  ;;  %v207_v50 = vpop.f32.mrb[3].mxu0 }
 0x11d   :  { %v208_v51 = vadd.f32 %v207_v50, %v63_v39  ;;  %v559_v52 = vpack.c.bf16 %v217_v45, %v216_v47 }
 0x11e   :  { %v219_v53 = vmax.f32 %v213_v49, 0.0 }
 0x11f   :  { %v218_v54 = vmax.f32 %v208_v51, 0.0  ;;  %560 = vmatprep.subr.bf16.mxu1 %v559_v52 }
 0x120   :  { %562 = vmatpush3.bf16.msra.mxu1 %v559_v52 }
 0x121   :  { %v563_v55 = vpack.c.bf16 %v219_v53, %v218_v54 }
 0x123   :  { %564 = vmatprep.subr.bf16.mxu1 %v563_v55 }
 0x124   :  { %566 = vmatpush3.bf16.msra.mxu1 %v563_v55 }
 0x125   :  { %567 = vmatprep.subr.bf16.mxu1 %v577_v57 }
 0x127   :  { %502 = vmatmul.mubr.msk.f32.vlgmr.msra.gmra.mrb[0].mxu1 %vm234_vm2, %v221_v56 }
 0x128   :  { %508 = vmatprep.mubr.msk.f32.mxu1 %vm578_vm3, %v579_v58 }
 0x1fa   :  { %v503_v60 = vpop.f32.mrb[0].mxu1 }
 0x1fb   :  { %v313_v62 = vadd.f32 %v503_v60, %v232_v59  ;;  %v307_v63 = vpop.f32.mrb[1].mxu1 }
 0x1fc   :  { %v308_v0 = vadd.f32 %v307_v63, %v227_v61 }
 0x1fd   :  { %v317_v1 = vmax.f32 %v313_v62, 0.0 }
 0x1fe   :  { %v316_v2 = vmax.f32 %v308_v0, 0.0 }
 0x200   :  { %v568_v3 = vpack.c.bf16 %v317_v1, %v316_v2 }
 0x202   :  { %569 = vmatpush3.bf16.msra.mxu1 %v568_v3 }
 0x205   :  { %509 = vmatmul.mubr.msk.f32.vlgmr.msra.gmra.mrb[2].mxu1 %vm70_vm0, %v318_v4 }
 0x2d8   :  { %v394_v6 = vpop.f32.mrb[2].mxu1 }
 0x2d9   :  { %v395_v7 = vadd.f32 %v394_v6, %v323_v5  ;;  %v510_v8 = vpop.f32.mrb[3].mxu1 }
 0x2db   :  { %398 = vst [vmem:[%s765_s7] sm:$0xf] %v395_v7 }

</bundles_post_ra>
